<compile_context>
chip_gen: v7x
topology: tpu7x:2x2x1
jax: 0.10.0
libtpu: 0.0.40
codegen_flags: <defaults>
</compile_context>

<pallas_src>
import jax
import jax.numpy as jnp
from jax.experimental import pallas as pl
from jax.experimental.pallas import tpu as pltpu

_LANE = 128
_SUBLANE = 8


def _round_up(x, m):
    return ((x + m - 1) // m) * m


def _normalize_kernel(x_ref, mean_ref, std_ref, o_ref):
    # Elementwise hot path: (x - mean) * (1/std), broadcast over rows.
    x = x_ref[...]                            # (tile_n, tile_f)
    m = mean_ref[...]                         # (1, tile_f) -> broadcasts over rows
    s = std_ref[...]                          # (1, tile_f)
    inv_s = pl.reciprocal(s, approx=False)    # exact; cost hidden (mem-bound kernel)
    o_ref[...] = ((x - m) * inv_s).astype(o_ref.dtype)


def normalize(x, mean, std, *, vmem_budget_bytes=16 * 1024 * 1024):
    """(x - mean) / std with per-feature mean/std along the last axis.

    x:    [..., F]
    mean: [F]
    std:  [F]
    """
    orig_shape = x.shape
    F = orig_shape[-1]
    x2d = x.reshape(-1, F)
    N = x2d.shape[0]
    itemsize = jnp.dtype(x.dtype).itemsize

    # --- Feature tile: full F unless F is a large lane-aligned extent.
    if F % _LANE == 0 and F > 2048:
        tile_f = 2048
    else:
        tile_f = F  # full-extent block is always legal (lane-dense when F >= 128)

    # --- Row tile: largest that fits the VMEM budget for (x + out), each
    #     double-buffered by the pipeline (2 arrays x 2 buffers).
    budget_elems = vmem_budget_bytes // (4 * itemsize)
    tile_n = max(_SUBLANE, (budget_elems // tile_f) // _SUBLANE * _SUBLANE)
    tile_n = min(tile_n, 2048)                      # diminishing returns past ~2k rows
    tile_n = min(tile_n, _round_up(N, _SUBLANE))    # don't over-pad tiny inputs

    mean2d = mean.reshape(1, F).astype(x.dtype)
    std2d = std.reshape(1, F).astype(x.dtype)

    grid = (pl.cdiv(N, tile_n), pl.cdiv(F, tile_f))

    out2d = pl.pallas_call(
        _normalize_kernel,
        out_shape=jax.ShapeDtypeStruct((N, F), x.dtype),
        grid_spec=pltpu.PrefetchScalarGridSpec(
            num_scalar_prefetch=0,
            grid=grid,
            in_specs=[
                pl.BlockSpec((tile_n, tile_f), lambda i, j: (i, j)),  # x tile
                pl.BlockSpec((1, tile_f), lambda i, j: (0, j)),       # mean (per feature block)
                pl.BlockSpec((1, tile_f), lambda i, j: (0, j)),       # std  (per feature block)
            ],
            out_specs=pl.BlockSpec((tile_n, tile_f), lambda i, j: (i, j)),
        ),
        compiler_params=pltpu.CompilerParams(
            # Both axes are independent -> shard across TensorCores on v7x.
            dimension_semantics=("parallel", "parallel"),
            # Lift v5e's 16 MiB scoped default; tiles stay well under v7x's
            # 64 MiB physical VMEM.
            vmem_limit_bytes=32 * 1024 * 1024,
        ),
    )(x2d, mean2d, std2d)

    return out2d.reshape(orig_shape)


if __name__ == "__main__":
    key = jax.random.PRNGKey(0)
    kx, km, ks = jax.random.split(key, 3)

    # Small demo shape consistent with the actuator network's [batch, features]
    # inputs; N deliberately NOT a multiple of 8 to exercise the cdiv /
    # partial-block writeback path.
    N, F = 300, 128
    x = jax.random.normal(kx, (N, F), dtype=jnp.float32)
    mean = jax.random.normal(km, (F,), dtype=jnp.float32)
    # std must be positive; deterministic init
    std = jax.random.uniform(ks, (F,), dtype=jnp.float32, minval=0.5, maxval=2.0)

    out = normalize(x, mean, std)
    out = jax.block_until_ready(out)

    # Reference check against plain JAX semantics of (x - mean) / std
    ref = (x - mean[None, :]) / std[None, :]
    assert out.shape == ref.shape and out.dtype == ref.dtype
    assert jnp.max(jnp.abs(out - ref)) < 1e-5

    print("KERNEL_OK")
</pallas_src>

<mosaic_0001>
module attributes {stable_mosaic.version = 11 : i64} {
  func.func @_normalize_kernel(%arg0: i32, %arg1: i32, %arg2: memref<304x128xf32, #tpu.memory_space<vmem>>, %arg3: memref<1x128xf32, #tpu.memory_space<vmem>>, %arg4: memref<1x128xf32, #tpu.memory_space<vmem>>, %arg5: memref<304x128xf32, #tpu.memory_space<vmem>>) attributes {dimension_semantics = [#tpu.dimension_semantics<parallel>, #tpu.dimension_semantics<parallel>], iteration_bounds = array<i64: 1, 1>, scalar_prefetch = 0 : i64, scratch_operands = 0 : i64, tpu.core_type = #tpu.core_type<tc>, window_params = [{transform_indices = @transform_0, window_bounds = array<i64: 304, 128>}, {transform_indices = @transform_1, window_bounds = array<i64: 1, 128>}, {transform_indices = @transform_2, window_bounds = array<i64: 1, 128>}, {transform_indices = @transform_3, window_bounds = array<i64: 304, 128>}]} {
    %c0 = arith.constant 0 : index
    %c0_0 = arith.constant 0 : index
    %0 = vector.load %arg2[%c0, %c0_0] : memref<304x128xf32, #tpu.memory_space<vmem>>, vector<304x128xf32>
    %c0_1 = arith.constant 0 : index
    %c0_2 = arith.constant 0 : index
    %1 = vector.load %arg3[%c0_1, %c0_2] : memref<1x128xf32, #tpu.memory_space<vmem>>, vector<1x128xf32>
    %c0_3 = arith.constant 0 : index
    %c0_4 = arith.constant 0 : index
    %2 = vector.load %arg4[%c0_3, %c0_4] : memref<1x128xf32, #tpu.memory_space<vmem>>, vector<1x128xf32>
    %3 = tpu.reciprocal %2 : vector<1x128xf32> -> vector<1x128xf32>
    %4 = vector.broadcast %1 : vector<1x128xf32> to vector<304x128xf32>
    %5 = arith.subf %0, %4 : vector<304x128xf32>
    %6 = vector.broadcast %3 : vector<1x128xf32> to vector<304x128xf32>
    %7 = arith.mulf %5, %6 : vector<304x128xf32>
    %c0_5 = arith.constant 0 : index
    %c0_6 = arith.constant 0 : index
    %8 = vector.load %arg5[%c0_5, %c0_6] : memref<304x128xf32, #tpu.memory_space<vmem>>, vector<304x128xf32>
    tpu.vector_store %arg5[%c0_5, %c0_6], %7 {strides = array<i32>} : memref<304x128xf32, #tpu.memory_space<vmem>>, vector<304x128xf32>,
    return
  }
  func.func @transform_0(%arg0: i32, %arg1: i32) -> (i32, i32) {
    %c0_i32 = arith.constant 0 : i32
    return %arg0, %arg1 : i32, i32
  }
  func.func @transform_1(%arg0: i32, %arg1: i32) -> (i32, i32) {
    %c0_i32 = arith.constant 0 : i32
    %c0_i32_0 = arith.constant 0 : i32
    return %c0_i32, %arg1 : i32, i32
  }
  func.func @transform_2(%arg0: i32, %arg1: i32) -> (i32, i32) {
    %c0_i32 = arith.constant 0 : i32
    %c0_i32_0 = arith.constant 0 : i32
    return %c0_i32, %arg1 : i32, i32
  }
  func.func @transform_3(%arg0: i32, %arg1: i32) -> (i32, i32) {
    %c0_i32 = arith.constant 0 : i32
    return %arg0, %arg1 : i32, i32
  }
}

</mosaic_0001>

<bundles_post_ra>
// kernel: tpu_custom_call.1
= control target key start
LH: loop header
LB: loop body
LE: loop exit
PB: predicated region body
PF: predicated region fallthrough
CT: control target
= control target key end

     0   :  { %8 = vsyncpa [#allocation3], 0  ;;  %s615_s0 = inlined_call_operand.hbm [shape: f32[300,128], index: 0, kind: input, shape index: {}]   ;;  %s616_s1 = inlined_call_operand.vmem [shape: f32[1,128], index: 1, kind: input, shape index: {}]   ;;  %s617_s2 = inlined_call_operand.vmem [shape: f32[1,128], index: 2, kind: input, shape index: {}]   ;;  %s618_s3 = inlined_call_operand.hbm [shape: f32[300,128], index: 3, kind: output, shape index: {}]  }
   0x1   :  { %9 = vsyncpa [#allocation4], 0  ;;  %s268_s12 = smov [#allocation2]   ;;  %s220_s16 = scalar_lea.hbm %s615_s0, 4864 }
   0x2   :  { %s15_s13 = sshll.u32 %s268_s12, 4  ;;  %p221_p0 = scmp.ne.s32.totalorder %s615_s0, %s220_s16  ;;  %s16_s13 = int_to_ptr.vmem [resolvable:$true] %s15_s13 }
   0x3   :  { %p224_p1 = scmp.lt.u32.totalorder %s220_s16, %s615_s0 }
   0x5   :  { %p226_p2 = pnand %p224_p1, %p221_p0 }
   0x7   :  { %229 = shalt.err (!%p226_p2)
}
   0x8   :  { %s230_s21 = scalar_lea.vmem %s16_s13, 4864  ;;  %p235_p4 = scmp.lt.s32.totalorder %s16_s13, %s16_s13 }
   0x9   :  { %p231_p3 = scmp.ne.s32.totalorder %s16_s13, %s230_s21  ;;  %p236_p5 = scmp.lt.s32.totalorder %s230_s21, %s230_s21 }
   0xb   :  { %p237_p6 = por %p236_p5, %p235_p4 }
   0xd   :  { %p238_p7 = pnand %p237_p6, %p231_p3 }
   0xf   :  { %241 = shalt.err (!%p238_p7)
}
  0x10   :  { %s269_s22 = smov 128   ;;  %s270_s23 = smov 8  }
  0x11   :  { %21 = dma.hbm_to_vmem [thread:$0]  %s615_s0, 4864, %s16_s13, [#allocation3], %s269_s22, %s269_s22, %s270_s23  }
  0x12   :  { %264 = dma.done.wait [#allocation3], 4864  }
  0x13   :  { %265 = vsyncadd [#allocation3], 4294962432  ;;  %v115_v0 = vlaneseq  ;;  %v307_v1 = vld [vmem:[#allocation2] sm:$0xff]  ;;  %v319_v5 = vld [vmem:[#allocation2 + $0x8] sm:$0xff]  ;;  %s271_s0 = smov [#allocation5]  }
  0x14   :  { %v312_v2 = vld [vmem:[%s616_s1] ss:$0 sm:$0xff]  ;;  %v321_v6 = vld [vmem:[#allocation2 + $0x10] sm:$0xff]  ;;  %v323_v7 = vld [vmem:[#allocation2 + $0x18] sm:$0xff]  ;;  %s201_s1 = sshll.u32 %s271_s0, 4  ;;  %s202_s1 = int_to_ptr.vmem [resolvable:$true] %s201_s1 }
  0x15   :  { %v68_v3 = vld [vmem:[%s617_s2] sm:$0x1]  ;;  %v317_v4 = vshrl.u32 %v115_v0, 7  ;;  %v327_v9 = vld [vmem:[#allocation2 + $0x28] sm:$0xff]  ;;  %v329_v10 = vld [vmem:[#allocation2 + $0x30] sm:$0xff]  ;;  %v76_v14 = vsub.f32 %v307_v1, %v312_v2  ;;  %v77_v16 = vsub.f32 %v319_v5, %v312_v2  ;;  %v78_v20 = vsub.f32 %v321_v6, %v312_v2  ;;  %s242_s2 = scalar_lea.vmem %s202_s1, 4864  ;;  %p247_p9 = scmp.lt.s32.totalorder %s202_s1, %s202_s1 }
  0x16   :  { %218 = vrcp.f32 %v68_v3  ;;  %v325_v8 = vld [vmem:[#allocation2 + $0x20] sm:$0xff]  ;;  %v331_v11 = vld [vmem:[#allocation2 + $0x38] sm:$0xff]  ;;  %v335_v13 = vld [vmem:[#allocation2 + $0x48] sm:$0xff]  ;;  %v79_v21 = vsub.f32 %v323_v7, %v312_v2  ;;  %v81_v23 = vsub.f32 %v327_v9, %v312_v2  ;;  %v82_v27 = vsub.f32 %v329_v10, %v312_v2  ;;  %p243_p8 = scmp.ne.s32.totalorder %s202_s1, %s242_s2  ;;  %p248_p10 = scmp.lt.s32.totalorder %s242_s2, %s242_s2 }
  0x17   :  { %v333_v12 = vld [vmem:[#allocation2 + $0x40] sm:$0xff]  ;;  %v117_v15 = vsub.s32 0, %v317_v4  ;;  %v342_v17 = vld [vmem:[#allocation2 + $0x50] sm:$0xff]  ;;  %v344_v18 = vld [vmem:[#allocation2 + $0x58] sm:$0xff]  ;;  %v80_v22 = vsub.f32 %v325_v8, %v312_v2  ;;  %v83_v28 = vsub.f32 %v331_v11, %v312_v2  ;;  %v85_v30 = vsub.f32 %v335_v13, %v312_v2 }
  0x18   :  { %v346_v19 = vld [vmem:[#allocation2 + $0x60] sm:$0xff]  ;;  %v356_v24 = vld [vmem:[#allocation2 + $0x68] sm:$0xff]  ;;  %v358_v25 = vld [vmem:[#allocation2 + $0x70] sm:$0xff]  ;;  %v84_v29 = vsub.f32 %v333_v12, %v312_v2  ;;  %v86_v34 = vsub.f32 %v342_v17, %v312_v2  ;;  %v87_v35 = vsub.f32 %v344_v18, %v312_v2  ;;  %p249_p11 = por %p248_p10, %p247_p9 }
  0x19   :  { %v360_v26 = vld [vmem:[#allocation2 + $0x78] sm:$0xff]  ;;  %v370_v31 = vld [vmem:[#allocation2 + $0x80] sm:$0xff]  ;;  %v372_v32 = vld [vmem:[#allocation2 + $0x88] sm:$0xff]  ;;  %v88_v36 = vsub.f32 %v346_v19, %v312_v2  ;;  %v89_v37 = vsub.f32 %v356_v24, %v312_v2  ;;  %v90_v41 = vsub.f32 %v358_v25, %v312_v2 }
  0x1a   :  { %v374_v33 = vld [vmem:[#allocation2 + $0x90] sm:$0xff]  ;;  %v384_v38 = vld [vmem:[#allocation2 + $0x98] sm:$0xff]  ;;  %v386_v39 = vld [vmem:[#allocation2 + $0xa0] sm:$0xff]  ;;  %v91_v42 = vsub.f32 %v360_v26, %v312_v2  ;;  %v92_v43 = vsub.f32 %v370_v31, %v312_v2  ;;  %v93_v44 = vsub.f32 %v372_v32, %v312_v2  ;;  %p250_p12 = pnand %p249_p11, %p243_p8 }
  0x1b   :  { %v388_v40 = vld [vmem:[#allocation2 + $0xa8] sm:$0xff]  ;;  %v398_v45 = vld [vmem:[#allocation2 + $0xb0] sm:$0xff]  ;;  %v400_v46 = vld [vmem:[#allocation2 + $0xb8] sm:$0xff]  ;;  %v94_v48 = vsub.f32 %v374_v33, %v312_v2  ;;  %v95_v49 = vsub.f32 %v384_v38, %v312_v2  ;;  %v96_v50 = vsub.f32 %v386_v39, %v312_v2 }
  0x1c   :  { %v402_v47 = vld [vmem:[#allocation2 + $0xc0] sm:$0xff]  ;;  %v97_v51 = vsub.f32 %v388_v40, %v312_v2  ;;  %v412_v52 = vld [vmem:[#allocation2 + $0xc8] sm:$0xff]  ;;  %v414_v53 = vld [vmem:[#allocation2 + $0xd0] sm:$0xff]  ;;  %v98_v55 = vsub.f32 %v398_v45, %v312_v2  ;;  %v99_v56 = vsub.f32 %v400_v46, %v312_v2 }
  0x1d   :  { %v416_v54 = vld [vmem:[#allocation2 + $0xd8] sm:$0xff]  ;;  %v100_v57 = vsub.f32 %v402_v47, %v312_v2  ;;  %v426_v59 = vld [vmem:[#allocation2 + $0xe0] sm:$0xff]  ;;  %v428_v60 = vld [vmem:[#allocation2 + $0xe8] sm:$0xff]  ;;  %v619_v32 = vsub.f32 %v412_v52, %v312_v2 }
  0x1e   :  { %v430_v61 = vld [vmem:[#allocation2 + $0xf0] sm:$0xff]  ;;  %v440_v10 = vld [vmem:[#allocation2 + $0xf8] sm:$0xff]  ;;  %v442_v11 = vld [vmem:[#allocation2 + $0x100] sm:$0xff]  ;;  %v622_v39 = vsub.f32 %v426_v59, %v312_v2 }
  0x1f   :  { %v444_v17 = vld [vmem:[#allocation2 + $0x108] sm:$0xff]  ;;  %v454_v0 = vld [vmem:[#allocation2 + $0x110] sm:$0xff]  ;;  %v456_v4 = vld [vmem:[#allocation2 + $0x118] sm:$0xff]  ;;  %v625_v45 = vsub.f32 %v440_v10, %v312_v2  ;;  %v626_v47 = vsub.f32 %v442_v11, %v312_v2 }
  0x20   :  { %v219_v62 = vpop.eup %218  ;;  %v458_v63 = vld [vmem:[#allocation2 + $0x120] sm:$0xff]  ;;  %v109_v58 = vsub.f32 %v444_v17, %v312_v2  ;;  %v66_v38 = vld [vmem:[#allocation2 + $0x128] sm:$0xff] }
  0x21   :  { %v446_v18 = vrot.slane %v219_v62, %v117_v15  ;;  %v111_v62 = vsub.f32 %v456_v4, %v312_v2 }
  0x23   :  { %v120_v3 = vmul.f32 %v446_v18, %v76_v14  ;;  %v121_v25 = vmul.f32 %v446_v18, %v77_v16  ;;  %v122_v15 = vmul.f32 %v446_v18, %v78_v20  ;;  %v123_v26 = vmul.f32 %v446_v18, %v79_v21 }
  0x24   :  { %v124_v1 = vmul.f32 %v446_v18, %v80_v22  ;;  %v125_v5 = vmul.f32 %v446_v18, %v81_v23  ;;  %v126_v14 = vmul.f32 %v446_v18, %v82_v27  ;;  %v127_v6 = vmul.f32 %v446_v18, %v83_v28 }
  0x25   :  { %158 = vst [vmem:[#allocation5] sm:$0xff] %v120_v3  ;;  %159 = vst [vmem:[#allocation5 + $0x8] sm:$0xff] %v121_v25  ;;  %v128_v7 = vmul.f32 %v446_v18, %v84_v29  ;;  %v129_v8 = vmul.f32 %v446_v18, %v85_v30  ;;  %v130_v9 = vmul.f32 %v446_v18, %v86_v34 }
  0x26   :  { %160 = vst [vmem:[#allocation5 + $0x10] sm:$0xff] %v122_v15  ;;  %161 = vst [vmem:[#allocation5 + $0x18] sm:$0xff] %v123_v26  ;;  %v131_v16 = vmul.f32 %v446_v18, %v87_v35  ;;  %v132_v12 = vmul.f32 %v446_v18, %v88_v36  ;;  %v133_v13 = vmul.f32 %v446_v18, %v89_v37 }
  0x27   :  { %162 = vst [vmem:[#allocation5 + $0x20] sm:$0xff] %v124_v1  ;;  %163 = vst [vmem:[#allocation5 + $0x28] sm:$0xff] %v125_v5  ;;  %v134_v20 = vmul.f32 %v446_v18, %v90_v41  ;;  %v135_v21 = vmul.f32 %v446_v18, %v91_v42  ;;  %v136_v19 = vmul.f32 %v446_v18, %v92_v43 }
  0x28   :  { %164 = vst [vmem:[#allocation5 + $0x30] sm:$0xff] %v126_v14  ;;  %165 = vst [vmem:[#allocation5 + $0x38] sm:$0xff] %v127_v6  ;;  %v137_v22 = vmul.f32 %v446_v18, %v93_v44  ;;  %v138_v23 = vmul.f32 %v446_v18, %v94_v48  ;;  %v139_v24 = vmul.f32 %v446_v18, %v95_v49 }
  0x29   :  { %166 = vst [vmem:[#allocation5 + $0x40] sm:$0xff] %v128_v7  ;;  %167 = vst [vmem:[#allocation5 + $0x48] sm:$0xff] %v129_v8  ;;  %v140_v27 = vmul.f32 %v446_v18, %v96_v50  ;;  %v141_v28 = vmul.f32 %v446_v18, %v97_v51  ;;  %v142_v29 = vmul.f32 %v446_v18, %v98_v55 }
  0x2a   :  { %168 = vst [vmem:[#allocation5 + $0x50] sm:$0xff] %v130_v9  ;;  %169 = vst [vmem:[#allocation5 + $0x58] sm:$0xff] %v131_v16  ;;  %v143_v30 = vmul.f32 %v446_v18, %v99_v56  ;;  %v144_v31 = vmul.f32 %v446_v18, %v100_v57  ;;  %v145_v33 = vmul.f32 %v446_v18, %v619_v32 }
  0x2b   :  { %170 = vst [vmem:[#allocation5 + $0x60] sm:$0xff] %v132_v12  ;;  %171 = vst [vmem:[#allocation5 + $0x68] sm:$0xff] %v133_v13  ;;  %v620_v34 = vsub.f32 %v414_v53, %v312_v2  ;;  %v621_v36 = vsub.f32 %v416_v54, %v312_v2  ;;  %v148_v40 = vmul.f32 %v446_v18, %v622_v39 }
  0x2c   :  { %172 = vst [vmem:[#allocation5 + $0x70] sm:$0xff] %v134_v20  ;;  %173 = vst [vmem:[#allocation5 + $0x78] sm:$0xff] %v135_v21  ;;  %v623_v41 = vsub.f32 %v428_v60, %v312_v2  ;;  %v624_v43 = vsub.f32 %v430_v61, %v312_v2  ;;  %v151_v46 = vmul.f32 %v446_v18, %v625_v45 }
  0x2d   :  { %174 = vst [vmem:[#allocation5 + $0x80] sm:$0xff] %v136_v19  ;;  %175 = vst [vmem:[#allocation5 + $0x88] sm:$0xff] %v137_v22  ;;  %v146_v35 = vmul.f32 %v446_v18, %v620_v34  ;;  %v147_v37 = vmul.f32 %v446_v18, %v621_v36  ;;  %v152_v48 = vmul.f32 %v446_v18, %v626_v47 }
  0x2e   :  { %176 = vst [vmem:[#allocation5 + $0x90] sm:$0xff] %v138_v23  ;;  %177 = vst [vmem:[#allocation5 + $0x98] sm:$0xff] %v139_v24  ;;  %v149_v42 = vmul.f32 %v446_v18, %v623_v41  ;;  %v150_v44 = vmul.f32 %v446_v18, %v624_v43  ;;  %v153_v49 = vmul.f32 %v446_v18, %v109_v58 }
  0x2f   :  { %178 = vst [vmem:[#allocation5 + $0xa0] sm:$0xff] %v140_v27  ;;  %179 = vst [vmem:[#allocation5 + $0xa8] sm:$0xff] %v141_v28  ;;  %v627_v50 = vsub.f32 %v454_v0, %v312_v2  ;;  %v155_v52 = vmul.f32 %v446_v18, %v111_v62  ;;  %v628_v53 = vsub.f32 %v458_v63, %v312_v2 }
  0x30   :  { %180 = vst [vmem:[#allocation5 + $0xb0] sm:$0xff] %v142_v29  ;;  %181 = vst [vmem:[#allocation5 + $0xb8] sm:$0xff] %v143_v30  ;;  %v113_v55 = vsub.f32 %v66_v38, %v312_v2 }
  0x31   :  { %182 = vst [vmem:[#allocation5 + $0xc0] sm:$0xff] %v144_v31  ;;  %183 = vst [vmem:[#allocation5 + $0xc8] sm:$0xff] %v145_v33  ;;  %v154_v51 = vmul.f32 %v446_v18, %v627_v50  ;;  %v156_v54 = vmul.f32 %v446_v18, %v628_v53 }
  0x32   :  { %184 = vst [vmem:[#allocation5 + $0xd0] sm:$0xff] %v146_v35  ;;  %185 = vst [vmem:[#allocation5 + $0xd8] sm:$0xff] %v147_v37  ;;  %v157_v56 = vmul.f32 %v446_v18, %v113_v55 }
  0x33   :  { %186 = vst [vmem:[#allocation5 + $0xe0] sm:$0xff] %v148_v40  ;;  %187 = vst [vmem:[#allocation5 + $0xe8] sm:$0xff] %v149_v42 }
  0x34   :  { %188 = vst [vmem:[#allocation5 + $0xf0] sm:$0xff] %v150_v44  ;;  %189 = vst [vmem:[#allocation5 + $0xf8] sm:$0xff] %v151_v46 }
  0x35   :  { %190 = vst [vmem:[#allocation5 + $0x100] sm:$0xff] %v152_v48  ;;  %191 = vst [vmem:[#allocation5 + $0x108] sm:$0xff] %v153_v49 }
  0x36   :  { %192 = vst [vmem:[#allocation5 + $0x110] sm:$0xff] %v154_v51  ;;  %193 = vst [vmem:[#allocation5 + $0x118] sm:$0xff] %v155_v52 }
  0x37   :  { %194 = vst [vmem:[#allocation5 + $0x120] sm:$0xff] %v156_v54  ;;  %195 = vst [vmem:[#allocation5 + $0x128] sm:$0xff] %v157_v56 }
  0x38   :  { %253 = shalt.err (!%p250_p12)
}
  0x39   :  { %s254_s5 = scalar_lea.hbm %s618_s3, 4864 }
  0x3a   :  { %p255_p13 = scmp.ne.s32.totalorder %s618_s3, %s254_s5  ;;  %p258_p0 = scmp.lt.u32.totalorder %s254_s5, %s618_s3 }
  0x3c   :  { %p260_p1 = pnand %p258_p0, %p255_p13 }
  0x3e   :  { %263 = shalt.err (!%p260_p1)
}
  0x3f   :  { %207 = dma.vmem_to_hbm [thread:$0]  %s202_s1, 4864, %s618_s3, [#allocation4], %s269_s22, %s269_s22, %s270_s23  }
  0x40   :  { %266 = dma.done.wait [#allocation4], 4864  }
  0x41   :  { %267 = vsyncadd [#allocation4], 4294962432 }
  0x42   :  { %211 = vsyncpa [#allocation3], 1 }
  0x43   :  { %212 = vsyncpa [#allocation4], 1 }

</bundles_post_ra>
